<compile_context>
chip_gen: v7x
topology: tpu7x:2x2x1
jax: 0.10.0
libtpu: 0.0.40
codegen_flags: <defaults>
</compile_context>

<pallas_src>
import functools

import jax
import jax.numpy as jnp
from jax.experimental import pallas as pl
from jax.experimental.pallas import tpu as pltpu


def _gated_conv_kernel(x_ref, wf_ref, bf_ref, o_ref, xp_ref, *, H, W):
    # x_ref : (1, Cin, H*W)           one batch element, flattened spatial
    # wf_ref: (3, 3, 2*Cout, Cin)     fused (conv | gate) weights, per tap
    # bf_ref: (2*Cout, 1)             fused bias
    # o_ref : (1, Cout, H*W)          output tile (lane-dense)
    # xp_ref: (Cin, pad + H*W + pad)  zero-framed scratch for shifted windows
    HW = H * W
    Cin = x_ref.shape[1]
    Cout = o_ref.shape[1]
    pad = (xp_ref.shape[1] - HW) // 2   # multiple of 128, >= W + 1

    # Zero-framed copy of this image: realizes padding=1 without an HBM-side
    # jnp.pad pass.  The middle store is lane-aligned (pad % 128 == 0).
    xp_ref[...] = jnp.zeros_like(xp_ref)
    xp_ref[:, pl.ds(pad, HW)] = x_ref[0].astype(jnp.float32)

    # Column index of every output pixel; used to mask the horizontal taps
    # (a +/-1 lane shift would otherwise wrap into the neighbouring row).
    col = jax.lax.broadcasted_iota(jnp.int32, (Cin, HW), 1) % W
    not_first_col = col >= 1          # valid source columns for dw = -1
    not_last_col = col <= W - 2       # valid source columns for dw = +1

    # Accumulator (2*Cout, H*W) with the fused bias folded into the init.
    acc = jnp.broadcast_to(bf_ref[...].astype(jnp.float32), (2 * Cout, HW))

    # 9 taps -> 9 fused (2*Cout, Cin) @ (Cin, H*W) MXU matmuls.
    for dh in (-1, 0, 1):
        for dw in (-1, 0, 1):
            off = dh * W + dw
            xs = xp_ref[:, pl.ds(pad + off, HW)]      # shifted window (Cin, H*W)
            if dw == -1:
                xs = jnp.where(not_first_col, xs, 0.0)
            elif dw == 1:
                xs = jnp.where(not_last_col, xs, 0.0)
            w_tap = wf_ref[dh + 1, dw + 1].astype(jnp.float32)   # (2*Cout, Cin)
            acc = acc + jnp.dot(w_tap, xs, preferred_element_type=jnp.float32)

    conv_out = acc[:Cout]
    gate_out = acc[Cout:]
    o_ref[0] = (conv_out * jax.nn.sigmoid(gate_out)).astype(o_ref.dtype)


@jax.jit
def gated_convolution(x, w_conv, b_conv, w_gate, b_gate):
    """Gated conv: conv3x3(x) * sigmoid(gate3x3(x)), padding=1.

    x      : (N, Cin, H, W)   float32 (PyTorch NCHW layout)
    w_conv : (Cout, Cin, 3, 3), b_conv: (Cout,)   (PyTorch OIHW layout)
    w_gate : (Cout, Cin, 3, 3), b_gate: (Cout,)
    returns: (N, Cout, H, W)
    """
    N, Cin, H, W = x.shape
    Cout = w_conv.shape[0]
    HW = H * W

    # Flatten spatial dims (contiguous reshape -> free) so H*W is lane-dense.
    x_flat = x.reshape(N, Cin, HW)

    # Fuse conv|gate weights along Cout and lay them out per tap:
    # wf[kh, kw] is one (2*Cout, Cin) matmul operand.
    wf = jnp.transpose(jnp.concatenate([w_conv, w_gate], axis=0), (2, 3, 0, 1))
    bf = jnp.concatenate([b_conv, b_gate]).reshape(2 * Cout, 1)

    # Zero-frame width for the in-kernel shifts; a multiple of 128 keeps the
    # scratch copy-in store lane-aligned.
    pad = pl.cdiv(W + 1, 128) * 128

    kernel = functools.partial(_gated_conv_kernel, H=H, W=W)

    out_flat = pl.pallas_call(
        kernel,
        out_shape=jax.ShapeDtypeStruct((N, Cout, HW), x.dtype),
        grid_spec=pltpu.PrefetchScalarGridSpec(
            num_scalar_prefetch=0,
            grid=(N,),
            in_specs=[
                pl.BlockSpec((1, Cin, HW), lambda n: (n, 0, 0)),
                pl.BlockSpec((3, 3, 2 * Cout, Cin), lambda n: (0, 0, 0, 0)),
                pl.BlockSpec((2 * Cout, 1), lambda n: (0, 0)),
            ],
            out_specs=pl.BlockSpec((1, Cout, HW), lambda n: (n, 0, 0)),
            scratch_shapes=[pltpu.VMEM((Cin, pad + HW + pad), jnp.float32)],
        ),
        compiler_params=pltpu.CompilerParams(
            dimension_semantics=("parallel",)),
    )(x_flat, wf, bf)

    # NOTE: for large H*W, tile the spatial axis (row blocks with a 1-row halo)
    # and set vmem_limit_bytes with headroom to stay within v7x's 64 MiB VMEM.
    return out_flat.reshape(N, Cout, H, W)


def _reference(x, w_conv, b_conv, w_gate, b_gate):
    """Pure-JAX reference matching nn.Conv2d(k=3, padding=1) semantics."""
    dn = jax.lax.conv_dimension_numbers(
        x.shape, w_conv.shape, ("NCHW", "OIHW", "NCHW"))
    conv = jax.lax.conv_general_dilated(
        x, w_conv, (1, 1), "SAME", dimension_numbers=dn)
    gate = jax.lax.conv_general_dilated(
        x, w_gate, (1, 1), "SAME", dimension_numbers=dn)
    conv = conv + b_conv[None, :, None, None]
    gate = gate + b_gate[None, :, None, None]
    return conv * jax.nn.sigmoid(gate)


if __name__ == "__main__":
    # Small shapes consistent with the module: batch=2, in_ch=4, out_ch=8, 16x16.
    N, Cin, Cout, H, W = 2, 4, 8, 16, 16

    key = jax.random.PRNGKey(0)
    kx, kwc, kbc, kwg, kbg = jax.random.split(key, 5)

    # Input / params in PyTorch conventions (NCHW activations, OIHW weights).
    x = jax.random.normal(kx, (N, Cin, H, W), dtype=jnp.float32)

    fan_in = Cin * 3 * 3
    bound = 1.0 / (fan_in ** 0.5)
    w_conv = jax.random.uniform(kwc, (Cout, Cin, 3, 3), jnp.float32, -bound, bound)
    b_conv = jax.random.uniform(kbc, (Cout,), jnp.float32, -bound, bound)
    w_gate = jax.random.uniform(kwg, (Cout, Cin, 3, 3), jnp.float32, -bound, bound)
    b_gate = jax.random.uniform(kbg, (Cout,), jnp.float32, -bound, bound)

    out = gated_convolution(x, w_conv, b_conv, w_gate, b_gate)
    out = jax.block_until_ready(out)

    ref = _reference(x, w_conv, b_conv, w_gate, b_gate)
    assert out.shape == (N, Cout, H, W)
    assert jnp.allclose(out, ref, rtol=1e-3, atol=1e-3), float(
        jnp.max(jnp.abs(out - ref)))

    print("KERNEL_OK")
</pallas_src>

<mosaic_0001>
module attributes {stable_mosaic.version = 11 : i64} {
  func.func @_gated_conv_kernel(%arg0: i32, %arg1: memref<1x4x256xf32, #tpu.memory_space<vmem>>, %arg2: memref<3x3x16x4xf32, #tpu.memory_space<vmem>>, %arg3: memref<16x1xf32, #tpu.memory_space<vmem>>, %arg4: memref<1x8x256xf32, #tpu.memory_space<vmem>>, %arg5: memref<4x512xf32, #tpu.memory_space<vmem>>) attributes {dimension_semantics = [#tpu.dimension_semantics<parallel>], iteration_bounds = array<i64: 2>, scalar_prefetch = 0 : i64, scratch_operands = 1 : i64, tpu.core_type = #tpu.core_type<tc>, window_params = [{transform_indices = @transform_0, window_bounds = array<i64: 1, 4, 256>}, {pipeline_mode = #tpu.pipeline_mode<synchronous>, transform_indices = @transform_1, window_bounds = array<i64: 3, 3, 16, 4>}, {pipeline_mode = #tpu.pipeline_mode<synchronous>, transform_indices = @transform_2, window_bounds = array<i64: 16, 1>}, {transform_indices = @transform_3, window_bounds = array<i64: 1, 8, 256>}]} {
    %cst = arith.constant 0.000000e+00 : f32
    %0 = vector.broadcast %cst : f32 to vector<4x512xf32>
    %c0 = arith.constant 0 : index
    %c0_0 = arith.constant 0 : index
    %1 = vector.load %arg5[%c0, %c0_0] : memref<4x512xf32, #tpu.memory_space<vmem>>, vector<4x512xf32>
    tpu.vector_store %arg5[%c0, %c0_0], %0 {strides = array<i32>} : memref<4x512xf32, #tpu.memory_space<vmem>>, vector<4x512xf32>,
    %c0_1 = arith.constant 0 : index
    %c0_2 = arith.constant 0 : index
    %c0_3 = arith.constant 0 : index
    %2 = vector.load %arg1[%c0_1, %c0_2, %c0_3] : memref<1x4x256xf32, #tpu.memory_space<vmem>>, vector<1x4x256xf32>
    %3 = vector.shape_cast %2 : vector<1x4x256xf32> to vector<4x256xf32>
    %c0_4 = arith.constant 0 : index
    %c128 = arith.constant 128 : index
    %4 = vector.load %arg5[%c0_4, %c128] : memref<4x512xf32, #tpu.memory_space<vmem>>, vector<4x256xf32>
    tpu.vector_store %arg5[%c0_4, %c128], %3 {strides = array<i32>} : memref<4x512xf32, #tpu.memory_space<vmem>>, vector<4x256xf32>,
    %5 = tpu.iota {dimensions = array<i32: 1>} : vector<4x256xi32>
    %c16_i32 = arith.constant 16 : i32
    %c0_i32 = arith.constant 0 : i32
    %6 = arith.cmpi eq, %c16_i32, %c0_i32 : i32
    %c1_i32 = arith.constant 1 : i32
    %7 = arith.select %6, %c1_i32, %c16_i32 : i32
    %8 = vector.broadcast %7 : i32 to vector<4x256xi32>
    %9 = arith.remsi %5, %8 : vector<4x256xi32>
    %c0_i32_5 = arith.constant 0 : i32
    %10 = vector.broadcast %c0_i32_5 : i32 to vector<4x256xi32>
    %11 = arith.cmpi ne, %9, %10 : vector<4x256xi32>
    %c0_i32_6 = arith.constant 0 : i32
    %12 = vector.broadcast %c0_i32_6 : i32 to vector<4x256xi32>
    %13 = arith.cmpi slt, %9, %12 : vector<4x256xi32>
    %c0_i32_7 = arith.constant 0 : i32
    %14 = arith.cmpi slt, %7, %c0_i32_7 : i32
    %15 = vector.broadcast %14 : i1 to vector<4x256xi1>
    %16 = vector.broadcast %15 : vector<4x256xi1> to vector<4x256xi1>
    %17 = arith.xori %13, %16 : vector<4x256xi1>
    %18 = arith.andi %17, %11 : vector<4x256xi1>
    %19 = vector.broadcast %7 : i32 to vector<4x256xi32>
    %20 = arith.addi %9, %19 : vector<4x256xi32>
    %21 = arith.select %18, %20, %9 : vector<4x256xi1>, vector<4x256xi32>
    %c1_i32_8 = arith.constant 1 : i32
    %22 = vector.broadcast %c1_i32_8 : i32 to vector<4x256xi32>
    %23 = arith.cmpi sge, %21, %22 : vector<4x256xi32>
    %c14_i32 = arith.constant 14 : i32
    %24 = vector.broadcast %c14_i32 : i32 to vector<4x256xi32>
    %25 = arith.cmpi sle, %21, %24 : vector<4x256xi32>
    %c0_9 = arith.constant 0 : index
    %c0_10 = arith.constant 0 : index
    %26 = vector.load %arg3[%c0_9, %c0_10] : memref<16x1xf32, #tpu.memory_space<vmem>>, vector<16x1xf32>
    %27 = vector.shape_cast %26 : vector<16x1xf32> to vector<16x1xf32>
    %28 = vector.broadcast %27 : vector<16x1xf32> to vector<16x256xf32>
    %c0_11 = arith.constant 0 : index
    %c111 = arith.constant 111 : index
    %29 = vector.load %arg5[%c0_11, %c111] : memref<4x512xf32, #tpu.memory_space<vmem>>, vector<4x256xf32>
    %cst_12 = arith.constant 0.000000e+00 : f32
    %30 = vector.broadcast %cst_12 : f32 to vector<4x256xf32>
    %31 = arith.select %23, %29, %30 : vector<4x256xi1>, vector<4x256xf32>
    %c0_13 = arith.constant 0 : index
    %c0_14 = arith.constant 0 : index
    %c0_15 = arith.constant 0 : index
    %c0_16 = arith.constant 0 : index
    %32 = vector.load %arg2[%c0_13, %c0_14, %c0_15, %c0_16] : memref<3x3x16x4xf32, #tpu.memory_space<vmem>>, vector<1x1x16x4xf32>
    %33 = vector.shape_cast %32 : vector<1x1x16x4xf32> to vector<16x4xf32>
    %cst_17 = arith.constant dense<0.000000e+00> : vector<16x256xf32>
    %34 = tpu.matmul %33, %31, %cst_17 {dimension_numbers = #tpu.dot_dimension_numbers<[1], [0], [0], [1], [0, 0, 1, 1], [], []>} : vector<16x4xf32>, vector<4x256xf32>, vector<16x256xf32> -> vector<16x256xf32>
    %35 = arith.addf %28, %34 : vector<16x256xf32>
    %c0_18 = arith.constant 0 : index
    %c112 = arith.constant 112 : index
    %36 = vector.load %arg5[%c0_18, %c112] : memref<4x512xf32, #tpu.memory_space<vmem>>, vector<4x256xf32>
    %c0_19 = arith.constant 0 : index
    %c1 = arith.constant 1 : index
    %c0_20 = arith.constant 0 : index
    %c0_21 = arith.constant 0 : index
    %37 = vector.load %arg2[%c0_19, %c1, %c0_20, %c0_21] : memref<3x3x16x4xf32, #tpu.memory_space<vmem>>, vector<1x1x16x4xf32>
    %38 = vector.shape_cast %37 : vector<1x1x16x4xf32> to vector<16x4xf32>
    %cst_22 = arith.constant dense<0.000000e+00> : vector<16x256xf32>
    %39 = tpu.matmul %38, %36, %cst_22 {dimension_numbers = #tpu.dot_dimension_numbers<[1], [0], [0], [1], [0, 0, 1, 1], [], []>} : vector<16x4xf32>, vector<4x256xf32>, vector<16x256xf32> -> vector<16x256xf32>
    %40 = arith.addf %35, %39 : vector<16x256xf32>
    %c0_23 = arith.constant 0 : index
    %c113 = arith.constant 113 : index
    %41 = vector.load %arg5[%c0_23, %c113] : memref<4x512xf32, #tpu.memory_space<vmem>>, vector<4x256xf32>
    %cst_24 = arith.constant 0.000000e+00 : f32
    %42 = vector.broadcast %cst_24 : f32 to vector<4x256xf32>
    %43 = arith.select %25, %41, %42 : vector<4x256xi1>, vector<4x256xf32>
    %c0_25 = arith.constant 0 : index
    %c2 = arith.constant 2 : index
    %c0_26 = arith.constant 0 : index
    %c0_27 = arith.constant 0 : index
    %44 = vector.load %arg2[%c0_25, %c2, %c0_26, %c0_27] : memref<3x3x16x4xf32, #tpu.memory_space<vmem>>, vector<1x1x16x4xf32>
    %45 = vector.shape_cast %44 : vector<1x1x16x4xf32> to vector<16x4xf32>
    %cst_28 = arith.constant dense<0.000000e+00> : vector<16x256xf32>
    %46 = tpu.matmul %45, %43, %cst_28 {dimension_numbers = #tpu.dot_dimension_numbers<[1], [0], [0], [1], [0, 0, 1, 1], [], []>} : vector<16x4xf32>, vector<4x256xf32>, vector<16x256xf32> -> vector<16x256xf32>
    %47 = arith.addf %40, %46 : vector<16x256xf32>
    %c0_29 = arith.constant 0 : index
    %c127 = arith.constant 127 : index
    %48 = vector.load %arg5[%c0_29, %c127] : memref<4x512xf32, #tpu.memory_space<vmem>>, vector<4x256xf32>
    %cst_30 = arith.constant 0.000000e+00 : f32
    %49 = vector.broadcast %cst_30 : f32 to vector<4x256xf32>
    %50 = arith.select %23, %48, %49 : vector<4x256xi1>, vector<4x256xf32>
    %c1_31 = arith.constant 1 : index
    %c0_32 = arith.constant 0 : index
    %c0_33 = arith.constant 0 : index
    %c0_34 = arith.constant 0 : index
    %51 = vector.load %arg2[%c1_31, %c0_32, %c0_33, %c0_34] : memref<3x3x16x4xf32, #tpu.memory_space<vmem>>, vector<1x1x16x4xf32>
    %52 = vector.shape_cast %51 : vector<1x1x16x4xf32> to vector<16x4xf32>
    %cst_35 = arith.constant dense<0.000000e+00> : vector<16x256xf32>
    %53 = tpu.matmul %52, %50, %cst_35 {dimension_numbers = #tpu.dot_dimension_numbers<[1], [0], [0], [1], [0, 0, 1, 1], [], []>} : vector<16x4xf32>, vector<4x256xf32>, vector<16x256xf32> -> vector<16x256xf32>
    %54 = arith.addf %47, %53 : vector<16x256xf32>
    %c0_36 = arith.constant 0 : index
    %c128_37 = arith.constant 128 : index
    %55 = vector.load %arg5[%c0_36, %c128_37] : memref<4x512xf32, #tpu.memory_space<vmem>>, vector<4x256xf32>
    %c1_38 = arith.constant 1 : index
    %c1_39 = arith.constant 1 : index
    %c0_40 = arith.constant 0 : index
    %c0_41 = arith.constant 0 : index
    %56 = vector.load %arg2[%c1_38, %c1_39, %c0_40, %c0_41] : memref<3x3x16x4xf32, #tpu.memory_space<vmem>>, vector<1x1x16x4xf32>
    %57 = vector.shape_cast %56 : vector<1x1x16x4xf32> to vector<16x4xf32>
    %cst_42 = arith.constant dense<0.000000e+00> : vector<16x256xf32>
    %58 = tpu.matmul %57, %55, %cst_42 {dimension_numbers = #tpu.dot_dimension_numbers<[1], [0], [0], [1], [0, 0, 1, 1], [], []>} : vector<16x4xf32>, vector<4x256xf32>, vector<16x256xf32> -> vector<16x256xf32>
    %59 = arith.addf %54, %58 : vector<16x256xf32>
    %c0_43 = arith.constant 0 : index
    %c129 = arith.constant 129 : index
    %60 = vector.load %arg5[%c0_43, %c129] : memref<4x512xf32, #tpu.memory_space<vmem>>, vector<4x256xf32>
    %cst_44 = arith.constant 0.000000e+00 : f32
    %61 = vector.broadcast %cst_44 : f32 to vector<4x256xf32>
    %62 = arith.select %25, %60, %61 : vector<4x256xi1>, vector<4x256xf32>
    %c1_45 = arith.constant 1 : index
    %c2_46 = arith.constant 2 : index
    %c0_47 = arith.constant 0 : index
    %c0_48 = arith.constant 0 : index
    %63 = vector.load %arg2[%c1_45, %c2_46, %c0_47, %c0_48] : memref<3x3x16x4xf32, #tpu.memory_space<vmem>>, vector<1x1x16x4xf32>
    %64 = vector.shape_cast %63 : vector<1x1x16x4xf32> to vector<16x4xf32>
    %cst_49 = arith.constant dense<0.000000e+00> : vector<16x256xf32>
    %65 = tpu.matmul %64, %62, %cst_49 {dimension_numbers = #tpu.dot_dimension_numbers<[1], [0], [0], [1], [0, 0, 1, 1], [], []>} : vector<16x4xf32>, vector<4x256xf32>, vector<16x256xf32> -> vector<16x256xf32>
    %66 = arith.addf %59, %65 : vector<16x256xf32>
    %c0_50 = arith.constant 0 : index
    %c143 = arith.constant 143 : index
    %67 = vector.load %arg5[%c0_50, %c143] : memref<4x512xf32, #tpu.memory_space<vmem>>, vector<4x256xf32>
    %cst_51 = arith.constant 0.000000e+00 : f32
    %68 = vector.broadcast %cst_51 : f32 to vector<4x256xf32>
    %69 = arith.select %23, %67, %68 : vector<4x256xi1>, vector<4x256xf32>
    %c2_52 = arith.constant 2 : index
    %c0_53 = arith.constant 0 : index
    %c0_54 = arith.constant 0 : index
    %c0_55 = arith.constant 0 : index
    %70 = vector.load %arg2[%c2_52, %c0_53, %c0_54, %c0_55] : memref<3x3x16x4xf32, #tpu.memory_space<vmem>>, vector<1x1x16x4xf32>
    %71 = vector.shape_cast %70 : vector<1x1x16x4xf32> to vector<16x4xf32>
    %cst_56 = arith.constant dense<0.000000e+00> : vector<16x256xf32>
    %72 = tpu.matmul %71, %69, %cst_56 {dimension_numbers = #tpu.dot_dimension_numbers<[1], [0], [0], [1], [0, 0, 1, 1], [], []>} : vector<16x4xf32>, vector<4x256xf32>, vector<16x256xf32> -> vector<16x256xf32>
    %73 = arith.addf %66, %72 : vector<16x256xf32>
    %c0_57 = arith.constant 0 : index
    %c144 = arith.constant 144 : index
    %74 = vector.load %arg5[%c0_57, %c144] : memref<4x512xf32, #tpu.memory_space<vmem>>, vector<4x256xf32>
    %c2_58 = arith.constant 2 : index
    %c1_59 = arith.constant 1 : index
    %c0_60 = arith.constant 0 : index
    %c0_61 = arith.constant 0 : index
    %75 = vector.load %arg2[%c2_58, %c1_59, %c0_60, %c0_61] : memref<3x3x16x4xf32, #tpu.memory_space<vmem>>, vector<1x1x16x4xf32>
    %76 = vector.shape_cast %75 : vector<1x1x16x4xf32> to vector<16x4xf32>
    %cst_62 = arith.constant dense<0.000000e+00> : vector<16x256xf32>
    %77 = tpu.matmul %76, %74, %cst_62 {dimension_numbers = #tpu.dot_dimension_numbers<[1], [0], [0], [1], [0, 0, 1, 1], [], []>} : vector<16x4xf32>, vector<4x256xf32>, vector<16x256xf32> -> vector<16x256xf32>
    %78 = arith.addf %73, %77 : vector<16x256xf32>
    %c0_63 = arith.constant 0 : index
    %c145 = arith.constant 145 : index
    %79 = vector.load %arg5[%c0_63, %c145] : memref<4x512xf32, #tpu.memory_space<vmem>>, vector<4x256xf32>
    %cst_64 = arith.constant 0.000000e+00 : f32
    %80 = vector.broadcast %cst_64 : f32 to vector<4x256xf32>
    %81 = arith.select %25, %79, %80 : vector<4x256xi1>, vector<4x256xf32>
    %c2_65 = arith.constant 2 : index
    %c2_66 = arith.constant 2 : index
    %c0_67 = arith.constant 0 : index
    %c0_68 = arith.constant 0 : index
    %82 = vector.load %arg2[%c2_65, %c2_66, %c0_67, %c0_68] : memref<3x3x16x4xf32, #tpu.memory_space<vmem>>, vector<1x1x16x4xf32>
    %83 = vector.shape_cast %82 : vector<1x1x16x4xf32> to vector<16x4xf32>
    %cst_69 = arith.constant dense<0.000000e+00> : vector<16x256xf32>
    %84 = tpu.matmul %83, %81, %cst_69 {dimension_numbers = #tpu.dot_dimension_numbers<[1], [0], [0], [1], [0, 0, 1, 1], [], []>} : vector<16x4xf32>, vector<4x256xf32>, vector<16x256xf32> -> vector<16x256xf32>
    %85 = arith.addf %78, %84 : vector<16x256xf32>
    %86 = vector.extract_strided_slice %85 {offsets = [0, 0], sizes = [8, 256], strides = [1, 1]} : vector<16x256xf32> to vector<8x256xf32>
    %87 = vector.extract_strided_slice %85 {offsets = [8, 0], sizes = [8, 256], strides = [1, 1]} : vector<16x256xf32> to vector<8x256xf32>
    %88 = arith.negf %87 : vector<8x256xf32>
    %89 = math.exp %88 : vector<8x256xf32>
    %cst_70 = arith.constant 1.000000e+00 : f32
    %90 = vector.broadcast %cst_70 : f32 to vector<8x256xf32>
    %91 = arith.addf %90, %89 : vector<8x256xf32>
    %92 = arith.divf %90, %91 : vector<8x256xf32>
    %93 = arith.mulf %86, %92 : vector<8x256xf32>
    %c0_71 = arith.constant 0 : index
    %c0_72 = arith.constant 0 : index
    %c0_73 = arith.constant 0 : index
    %94 = vector.load %arg4[%c0_71, %c0_72, %c0_73] : memref<1x8x256xf32, #tpu.memory_space<vmem>>, vector<1x8x256xf32>
    %95 = vector.shape_cast %94 : vector<1x8x256xf32> to vector<8x256xf32>
    %96 = vector.shape_cast %93 : vector<8x256xf32> to vector<1x8x256xf32>
    tpu.vector_store %arg4[%c0_71, %c0_72, %c0_73], %96 {strides = array<i32>} : memref<1x8x256xf32, #tpu.memory_space<vmem>>, vector<1x8x256xf32>,
    return
  }
  func.func @transform_0(%arg0: i32) -> (i32, i32, i32) {
    %c0_i32 = arith.constant 0 : i32
    %c0_i32_0 = arith.constant 0 : i32
    %c0_i32_1 = arith.constant 0 : i32
    return %arg0, %c0_i32, %c0_i32_0 : i32, i32, i32
  }
  func.func @transform_1(%arg0: i32) -> (i32, i32, i32, i32) {
    %c0_i32 = arith.constant 0 : i32
    %c0_i32_0 = arith.constant 0 : i32
    %c0_i32_1 = arith.constant 0 : i32
    %c0_i32_2 = arith.constant 0 : i32
    %c0_i32_3 = arith.constant 0 : i32
    return %c0_i32, %c0_i32_0, %c0_i32_1, %c0_i32_2 : i32, i32, i32, i32
  }
  func.func @transform_2(%arg0: i32) -> (i32, i32) {
    %c0_i32 = arith.constant 0 : i32
    %c0_i32_0 = arith.constant 0 : i32
    %c0_i32_1 = arith.constant 0 : i32
    return %c0_i32, %c0_i32_0 : i32, i32
  }
  func.func @transform_3(%arg0: i32) -> (i32, i32, i32) {
    %c0_i32 = arith.constant 0 : i32
    %c0_i32_0 = arith.constant 0 : i32
    %c0_i32_1 = arith.constant 0 : i32
    return %arg0, %c0_i32, %c0_i32_0 : i32, i32, i32
  }
}

</mosaic_0001>

<bundles_post_ra>
// kernel: gated_convolution.1
= control target key start
LH: loop header
LB: loop body
LE: loop exit
PB: predicated region body
PF: predicated region fallthrough
CT: control target
= control target key end

     0   :  { %s1460_s12 = smov 0   ;;  %s1662_s0 = inlined_call_operand.vmem [shape: f32[2,4,256], index: 0, kind: input, shape index: {}]   ;;  %s1663_s1 = inlined_call_operand.vmem [shape: f32[3,3,16,4], index: 1, kind: input, shape index: {}]   ;;  %s1664_s2 = inlined_call_operand.vmem [shape: f32[16,1], index: 2, kind: input, shape index: {}]   ;;  %s1665_s3 = inlined_call_operand.vmem [shape: f32[2,8,256], index: 3, kind: output, shape index: {}]  }
   0x1 LB: > { %s1287_s13 = sadd.s32 4294967295, %s1428_s12   ;;  %p1291_p0 = scmp.ge.s32.totalorder %s1428_s12, 1  ;;  %s1428_s12 = sphi %s1460_s12, %s13_s12  }
   0x2   : > { %p137_p1 = scmp.lt.s32.totalorder %s1428_s12, 3 }
   0x4   : > { %p138_p2 = pnand %p1291_p0, %p137_p1 }
   0x5   : > { %p161_p3 = scmp.lt.s32.totalorder (!%p138_p2), %s1287_s13, 1  ;;  %v1430_v0 = vmov (!%p138_p2), 0.0   ;;  %s1431_s18 = smov (!%p138_p2), 127   ;;  %vm245_vm0 = vcmask (!%p138_p2), 1043456   ;;  %vm238_vm1 = vcmask (!%p138_p2), 31744   ;;  %v1318_v8 = vld [vmem:[%s1663_s1 + $0x40] sm:$0xff] (!%p138_p2)  ;;  %v175_v18 = vlaneseq (!%p138_p2) }
   0x6   : > { %141 = sbr.rel (%p138_p2) target bundleno = 438 (0x1b6), region = 32  ;;  %172 = vst [vmem:[#allocation2 + $0x8] sm:$0xff] (!%p138_p2), %v1430_v0  ;;  %171 = vst [vmem:[#allocation2] sm:$0xff] (!%p138_p2), %v1430_v0  ;;  %316 = vmatprep.mubr.f32.mxu1 (!%p138_p2), %v1430_v0  ;;  %749 = vmatprep.mubr.f32.mxu0 (!%p138_p2), %v1430_v0  ;;  %s1432_s19 = smov (!%p138_p2), 17   ;;  %v206_v14 = vld [vmem:[%s1664_s2] sm:$0xff] (!%p138_p2)  ;;  %v1439_v15 = vmov (!%p138_p2), 0  }
   0x7   : > { %s1433_s20 = smov (!%p138_p2), 16   ;;  %s1434_s23 = smov (!%p138_p2), 15   ;;  %1411 = vset.pattern.permute.xlu1 (!%p138_p2), %v1439_v15  ;;  %1410 = vset.pattern.permute.xlu0 (!%p138_p2), %v1439_v15  ;;  %v207_v16 = vld [vmem:[%s1664_s2 + $0x8] sm:$0xff] (!%p138_p2)  ;;  %v176_v19 = vand.u32 (!%p138_p2), 127, %v175_v18  ;;  %vm229_vm2 = vcmask (!%p138_p2), 138240   ;;  %vm347_vm5 = vcmask (!%p138_p2), 130048  }
   0x8   : > { %s1435_s24 = smov (!%p138_p2), 113   ;;  %s1436_s25 = smov (!%p138_p2), 1   ;;  %vm777_vm6 = vcmask (!%p138_p2), 1039360   ;;  %v236_v37 = vld [vmem:[%s1663_s1] sm:$0xff] (!%p138_p2)  ;;  %vm452_vm9 = vcmask (!%p138_p2), 121856   ;;  %v237_v48 = vld [vmem:[%s1663_s1 + $0x8] sm:$0xff] (!%p138_p2) }
   0x9   : > { %s1437_s26 = smov (!%p138_p2), 112   ;;  %s1438_s27 = smov (!%p138_p2), 111   ;;  %v177_v22 = vadd.s32 (!%p138_p2), 128, %v176_v19  ;;  %v182_v26 = vand.u32 (!%p138_p2), 15, %v176_v19  ;;  %v1324_v49 = vld [vmem:[%s1663_s1 + $0x50] sm:$0xff] (!%p138_p2)  ;;  %vm891_vm10 = vcmask (!%p138_p2), 924672  }
   0xa   : > { %v1300_v55 = vld [vmem:[%s1663_s1 + $0x10] sm:$0xff] (!%p138_p2)  ;;  %v1325_v56 = vld [vmem:[%s1663_s1 + $0x58] sm:$0xff] (!%p138_p2)  ;;  %vm566_vm11 = vcmask (!%p138_p2), 7168   ;;  %vm1008_vm12 = vcmask (!%p138_p2), 916480   ;;  %vm1113_vm13 = vcmask (!%p138_p2), 908288   ;;  %v1319_v30 = vld [vmem:[%s1663_s1 + $0x48] sm:$0xff] (!%p138_p2) }
   0xb   : > { %v189_v25 = vand.u32 (!%p138_p2), 15, %v177_v22  ;;  %vm1512_vm4 = vcmp.ge.s32.totalorder (!%p138_p2), %v182_v26, 1  ;;  %vm1524_vm7 = vcmp.le.s32.totalorder (!%p138_p2), %v182_v26, 14  ;;  %v1301_v62 = vld [vmem:[%s1663_s1 + $0x18] sm:$0xff] (!%p138_p2)  ;;  %v1312_v19 = vld [vmem:[%s1663_s1 + $0x30] sm:$0xff] (!%p138_p2) }
   0xc   : > { %v1337_v26 = vld [vmem:[%s1663_s1 + $0x78] sm:$0xff] (!%p138_p2) }
   0xd   : > { %s1675_s13 = smov (!%p161_p3, %s1287_s13), 1  ;;  %v767_v2 = vld [vmem:[#allocation2 + $0xc] sm:$0xf]  ;;  %vm1508_vm3 = vcmp.ge.s32.totalorder %v189_v25, 1  ;;  %vm1528_vm8 = vcmp.le.s32.totalorder %v189_v25, 14 }
   0xe   : > { %s1352_s14 = sshll.u32 %s1675_s13, 3  ;;  %775 = vrot.lane.b32.xlu1 %v767_v2, %s1431_s18  ;;  %v881_v10 = vld [vmem:[#allocation2 + $0xc] sm:$0xf]  ;;  %s1353_s16 = sshll.u32 %s1675_s13, 4 }
   0xf   : > { %s165_s17 = scalar_lea.vmem %s1662_s0, %s1352_s14  ;;  %v995_v12 = vld [vmem:[#allocation2 + $0xc] sm:$0xf] }
  0x10   : > { %v1478_v1 = vld [vmem:[%s165_s17] sm:$0xff]  ;;  %v1103_v13 = vld [vmem:[#allocation2 + $0xc] sm:$0xf] }
  0x11   : > { %174 = vst [vmem:[#allocation2 + $0x4] sm:$0xff] %v1478_v1  ;;  %v1483_v5 = vcombine.high %v1478_v1, %v1478_v1 }
  0x13   : > { %1320 = vmatprep.subr.msk.mxu0 %vm245_vm0, %v1483_v5 }
  0x14   : > { %1321 = vmatpush1.msk.msra.mxu0 %vm245_vm0, %v1478_v1 }
  0x15   : > { %1322 = vmatmul.mubr.msk.f32.vlgmr.msra.gmra.mrb[0].mxu0 %vm238_vm1, %v1318_v8 }
  0x16   : > { %863 = vmatprep.mubr.f32.mxu0 %v1430_v0 }
  0x18   : > { %v219_v3 = vld [vmem:[#allocation2 + $0x8] sm:$0xf]  ;;  %v218_v4 = vld [vmem:[#allocation2] sm:$0xff] }
  0x19   : > { %227 = vrot.lane.b32.xlu0 %v219_v3, %s1432_s19  ;;  %223 = vrot.lane.b32.xlu1 %v218_v4, %s1432_s19  ;;  %v334_v6 = vld [vmem:[#allocation2 + $0x8] sm:$0xf]  ;;  %v222_v7 = vcombine.high %v218_v4, %v218_v4 }
  0x1a   : > { %v442_v9 = vld [vmem:[#allocation2 + $0x8] sm:$0xf] }
  0x1b   : > { %v556_v11 = vld [vmem:[#allocation2 + $0x8] sm:$0xf] }
  0x1d   : > { %345 = vrot.lane.b32.xlu0 %v334_v6, %s1433_s20  ;;  %341 = vrot.lane.b32.xlu1 %v218_v4, %s1433_s20 }
  0x21   : > { %771 = vrot.lane.b32.xlu0 %v1478_v1, %s1431_s18  ;;  %343 = vrot.lane.b32.xlu1 %v222_v7, %s1433_s20 }
  0x25   : > { %225 = vrot.lane.b32.xlu0 %v222_v7, %s1432_s19  ;;  %448 = vrot.lane.b32.xlu1 %v222_v7, %s1434_s23  ;;  %s170_s19 = scalar_lea.vmem %s1665_s3, %s1353_s16 }
  0x29   : > { %773 = vrot.lane.b32.xlu0 %v1483_v5, %s1431_s18  ;;  %446 = vrot.lane.b32.xlu1 %v218_v4, %s1434_s23 }
  0x2d   : > { %450 = vrot.lane.b32.xlu0 %v442_v9, %s1434_s23  ;;  %889 = vrot.lane.b32.xlu1 %v881_v10, %s1435_s24 }
  0x31   : > { %887 = vrot.lane.b32.xlu0 %v1483_v5, %s1435_s24  ;;  %562 = vrot.lane.b32.xlu1 %v222_v7, %s1436_s25  ;;  %v1306_v7 = vld [vmem:[%s1663_s1 + $0x20] sm:$0xff] }
  0x35   : > { %885 = vrot.lane.b32.xlu0 %v1478_v1, %s1435_s24  ;;  %560 = vrot.lane.b32.xlu1 %v218_v4, %s1436_s25  ;;  %v1330_v4 = vld [vmem:[%s1663_s1 + $0x60] sm:$0xff] }
  0x39   : > { %564 = vrot.lane.b32.xlu0 %v556_v11, %s1436_s25  ;;  %1006 = vrot.lane.b32.xlu1 %v995_v12, %s1437_s26  ;;  %v1331_v12 = vld [vmem:[%s1663_s1 + $0x68] sm:$0xff] }
  0x3d   : > { %1004 = vrot.lane.b32.xlu0 %v1483_v5, %s1437_s26  ;;  %1109 = vrot.lane.b32.xlu1 %v1483_v5, %s1438_s27 }
  0x41   : > { %1002 = vrot.lane.b32.xlu0 %v1478_v1, %s1437_s26  ;;  %1107 = vrot.lane.b32.xlu1 %v1478_v1, %s1438_s27 }
  0x45   : > { %1111 = vrot.lane.b32.xlu0 %v1103_v13, %s1438_s27  ;;  %210 = vperm.xlu1 %1411, %v206_v14   ;;  %v1307_v14 = vld [vmem:[%s1663_s1 + $0x28] sm:$0xff] }
  0x49   : > { %215 = vperm.xlu0 %1410, %v207_v16  }
  0x80   : > { %v776_v17 = vpop.permute.xlu1 %775 }
  0x8b   : > { %v228_v20 = vpop.permute.xlu0 %227  ;;  %v224_v21 = vpop.permute.xlu1 %223 }
  0x8f   : > { %v346_v23 = vpop.permute.xlu0 %345  ;;  %v342_v24 = vpop.permute.xlu1 %341 }
  0x93   : > { %v772_v27 = vpop.permute.xlu0 %771  ;;  %v344_v28 = vpop.permute.xlu1 %343 }
  0x94   : > { %v349_v40 = vsel %vm347_vm5, %v344_v28, %v346_v23  ;;  %v348_v43 = vsel %vm347_vm5, %v342_v24, %v344_v28  ;;  %v1313_v24 = vld [vmem:[%s1663_s1 + $0x38] sm:$0xff] }
  0x97   : > { %v226_v31 = vpop.permute.xlu0 %225  ;;  %v449_v32 = vpop.permute.xlu1 %448 }
  0x98   : > { %v230_v33 = vsel %vm229_vm2, %v224_v21, %v226_v31  ;;  %v231_v34 = vsel %vm229_vm2, %v226_v31, %v228_v20  ;;  %v1336_v21 = vld [vmem:[%s1663_s1 + $0x70] sm:$0xff]  ;;  %v1343_v31 = vld [vmem:[%s1663_s1 + $0x88] sm:$0xff] }
  0x99   : > { %v235_v35 = vsel %vm1508_vm3, %v231_v34, 0.0  ;;  %v234_v36 = vsel %vm1512_vm4, %v230_v33, 0.0 }
  0x9a   : > { %1296 = vmatprep.subr.msk.mxu1 %vm245_vm0, %v235_v35 }
  0x9b   : > { %1297 = vmatpush1.msk.msra.mxu1 %vm245_vm0, %v234_v36  ;;  %v774_v41 = vpop.permute.xlu0 %773  ;;  %v447_v42 = vpop.permute.xlu1 %446 }
  0x9c   : > { %v778_v44 = vsel %vm777_vm6, %v772_v27, %v774_v41  ;;  %v779_v45 = vsel %vm777_vm6, %v774_v41, %v776_v17  ;;  %1298 = vmatmul.mubr.msk.f32.vlgmr.msra.gmra.mrb[0].mxu1 %vm238_vm1, %v236_v37  ;;  %1302 = vmatprep.subr.msk.mxu1 %vm245_vm0, %v349_v40  ;;  %v453_v53 = vsel %vm452_vm9, %v447_v42, %v449_v32 }
  0x9d   : > { %v782_v46 = vsel %vm1524_vm7, %v778_v44, 0.0  ;;  %v783_v47 = vsel %vm1528_vm8, %v779_v45, 0.0  ;;  %1303 = vmatpush1.msk.msra.mxu1 %vm245_vm0, %v348_v43  ;;  %322 = vmatprep.mubr.f32.mxu1 %v1430_v0  ;;  %v457_v59 = vsel %vm1524_vm7, %v453_v53, 0.0 }
  0x9e   : > { %1326 = vmatprep.subr.msk.mxu0 %vm245_vm0, %v783_v47 }
  0x9f   : > { %1327 = vmatpush1.msk.msra.mxu0 %vm245_vm0, %v782_v46  ;;  %v451_v50 = vpop.permute.xlu0 %450  ;;  %v890_v51 = vpop.permute.xlu1 %889 }
  0xa0   : > { %v454_v52 = vsel %vm452_vm9, %v449_v32, %v451_v50  ;;  %1299 = vmatmul.mubr.msk.f32.gmra.mrb[2].mxu1 %vm238_vm1, %v237_v48  ;;  %1328 = vmatmul.mubr.msk.f32.vlgmr.msra.gmra.mrb[0].mxu0 %vm238_vm1, %v1324_v49 }
  0xa1   : > { %v458_v54 = vsel %vm1528_vm8, %v454_v52, 0.0  ;;  %424 = vmatprep.mubr.f32.mxu1 %v1430_v0  ;;  %869 = vmatprep.mubr.f32.mxu0 %v1430_v0 }
  0xa2   : > { %1308 = vmatprep.subr.msk.mxu1 %vm245_vm0, %v458_v54 }
  0xa3   : > { %v888_v57 = vpop.permute.xlu0 %887  ;;  %v563_v58 = vpop.permute.xlu1 %562 }
  0xa4   : > { %v893_v60 = vsel %vm891_vm10, %v888_v57, %v890_v51  ;;  %1304 = vmatmul.mubr.msk.f32.vlgmr.msra.gmra.mrb[0].mxu1 %vm238_vm1, %v1300_v55  ;;  %1329 = vmatmul.mubr.msk.f32.gmra.mrb[2].mxu0 %vm238_vm1, %v1325_v56 }
  0xa5   : > { %v897_v61 = vsel %vm1508_vm3, %v893_v60, 0.0  ;;  %1309 = vmatpush1.msk.msra.mxu1 %vm245_vm0, %v457_v59  ;;  %430 = vmatprep.mubr.f32.mxu1 %v1430_v0 }
  0xa6   : > { %1332 = vmatprep.subr.msk.mxu0 %vm245_vm0, %v897_v61  ;;  %977 = vmatprep.mubr.f32.mxu0 %v1430_v0 }
  0xa7   : > { %v886_v63 = vpop.permute.xlu0 %885  ;;  %v561_v2 = vpop.permute.xlu1 %560 }
  0xa8   : > { %v892_v3 = vsel %vm891_vm10, %v886_v63, %v888_v57  ;;  %1305 = vmatmul.mubr.msk.f32.gmra.mrb[2].mxu1 %vm238_vm1, %v1301_v62  ;;  %v567_v8 = vsel %vm566_vm11, %v561_v2, %v563_v58 }
  0xa9   : > { %v896_v6 = vsel %vm1512_vm4, %v892_v3, 0.0  ;;  %538 = vmatprep.mubr.f32.mxu1 %v1430_v0  ;;  %v571_v15 = vsel %vm1512_vm4, %v567_v8, 0.0 }
  0xaa   : > { %1333 = vmatpush1.msk.msra.mxu0 %vm245_vm0, %v896_v6 }
  0xab   : > { %v565_v9 = vpop.permute.xlu0 %564  ;;  %v1007_v10 = vpop.permute.xlu1 %1006  ;;  %1334 = vmatmul.mubr.msk.f32.vlgmr.msra.gmra.mrb[0].mxu0 %vm238_vm1, %v1330_v4 }
  0xac   : > { %v568_v11 = vsel %vm566_vm11, %v563_v58, %v565_v9  ;;  %1310 = vmatmul.mubr.msk.f32.vlgmr.msra.gmra.mrb[0].mxu1 %vm238_vm1, %v1306_v7  ;;  %983 = vmatprep.mubr.f32.mxu0 %v1430_v0 }
  0xad   : > { %v572_v13 = vsel %vm1508_vm3, %v568_v11, 0.0  ;;  %544 = vmatprep.mubr.f32.mxu1 %v1430_v0 }
  0xae   : > { %1314 = vmatprep.subr.msk.mxu1 %vm245_vm0, %v572_v13 }
  0xaf   : > { %1315 = vmatpush1.msk.msra.mxu1 %vm245_vm0, %v571_v15  ;;  %v1005_v16 = vpop.permute.xlu0 %1004  ;;  %v1110_v17 = vpop.permute.xlu1 %1109  ;;  %1335 = vmatmul.mubr.msk.f32.gmra.mrb[2].mxu0 %vm238_vm1, %v1331_v12 }
  0xb0   : > { %v1010_v18 = vsel %vm1008_vm12, %v1005_v16, %v1007_v10  ;;  %1311 = vmatmul.mubr.msk.f32.gmra.mrb[2].mxu1 %vm238_vm1, %v1307_v14  ;;  %1085 = vmatprep.mubr.f32.mxu0 %v1430_v0 }
  0xb1   : > { %1338 = vmatprep.subr.msk.mxu0 %vm245_vm0, %v1010_v18  ;;  %652 = vmatprep.mubr.f32.mxu1 %v1430_v0 }
  0xb2   : > { %1354 = vmatprep.subr.msk.mxu1 %vm245_vm0, %v1483_v5 }
  0xb3   : > { %v1003_v20 = vpop.permute.xlu0 %1002  ;;  %v1108_v23 = vpop.permute.xlu1 %1107 }
  0xb4   : > { %v1009_v22 = vsel %vm1008_vm12, %v1003_v20, %v1005_v16  ;;  %1316 = vmatmul.mubr.msk.f32.vlgmr.msra.gmra.mrb[0].mxu1 %vm238_vm1, %v1312_v19  ;;  %v1114_v5 = vsel %vm1113_vm13, %v1108_v23, %v1110_v17 }
  0xb5   : > { %1339 = vmatpush1.msk.msra.mxu0 %vm245_vm0, %v1009_v22  ;;  %658 = vmatprep.mubr.f32.mxu1 %v1430_v0  ;;  %v1118_v29 = vsel %vm1524_vm7, %v1114_v5, 0.0 }
  0xb6   : > { %1340 = vmatmul.mubr.msk.f32.vlgmr.msra.gmra.mrb[0].mxu0 %vm238_vm1, %v1336_v21  ;;  %1355 = vmatpush1.msk.msra.mxu1 %vm245_vm0, %v1478_v1  ;;  %v1342_v1 = vld [vmem:[%s1663_s1 + $0x80] sm:$0xff] }
  0xb7   : > { %v1112_v25 = vpop.permute.xlu0 %1111  ;;  %1091 = vmatprep.mubr.f32.mxu0 %v1430_v0 }
  0xb8   : > { %v1115_v27 = vsel %vm1113_vm13, %v1110_v17, %v1112_v25  ;;  %1317 = vmatmul.mubr.msk.f32.gmra.mrb[2].mxu1 %vm238_vm1, %v1313_v24 }
  0xb9   : > { %v1119_v28 = vsel %vm1528_vm8, %v1115_v27, 0.0  ;;  %755 = vmatprep.mubr.f32.mxu1 %v1430_v0 }
  0xba   : > { %1341 = vmatmul.mubr.msk.f32.gmra.mrb[2].mxu0 %vm238_vm1, %v1337_v26  ;;  %1344 = vmatprep.subr.msk.mxu0 %vm245_vm0, %v1119_v28 }
  0xbb   : > { %1345 = vmatpush1.msk.msra.mxu0 %vm245_vm0, %v1118_v29  ;;  %1199 = vmatprep.mubr.f32.mxu0 %v1430_v0 }
  0xbe   : > { %1346 = vmatmul.mubr.msk.f32.vlgmr.msra.gmra.mrb[0].mxu0 %vm238_vm1, %v1342_v1 }
  0xbf   : > { %1205 = vmatprep.mubr.f32.mxu0 %v1430_v0 }
  0xc0   : > { %1323 = vmatmul.mubr.msk.f32.vlgmr.msra.gmra.mrb[2].mxu1 %vm238_vm1, %v1319_v30 }
  0xc2   : > { %1347 = vmatmul.mubr.msk.f32.gmra.mrb[2].mxu0 %vm238_vm1, %v1343_v31 }
  0xc4   : > { %v211_v34 = vpop.permute.xlu1 %210 }
  0xc8   : > { %v216_v38 = vpop.permute.xlu0 %215 }
 0x187   : > { %v654_v32 = vpop.f32.mrb[0].mxu1 }
 0x188   : > { %v656_v33 = vpop.f32.mrb[1].mxu1  ;;  %v1356_v35 = vadd.f32 %v654_v32, %v211_v34 }
 0x189   : > { %v1358_v36 = vadd.f32 %v656_v33, %v211_v34 }
 0x191   : > { %v1201_v37 = vpop.f32.mrb[0].mxu0 }
 0x192   : > { %v1357_v39 = vadd.f32 %v1356_v35, %v1201_v37  ;;  %v1203_v40 = vpop.f32.mrb[1].mxu0 }
 0x193   : > { %v1359_v41 = vadd.f32 %v1358_v36, %v1203_v40  ;;  %v757_v42 = vpop.f32.mrb[2].mxu1 }
 0x194   : > { %v1360_v0 = vadd.f32 %v757_v42, %v216_v38  ;;  %v759_v43 = vpop.f32.mrb[3].mxu1 }
 0x195   : > { %v1362_v44 = vadd.f32 %v759_v43, %v216_v38  ;;  %v1207_v45 = vpop.f32.mrb[2].mxu0 }
 0x196   : > { %v1361_v46 = vadd.f32 %v1360_v0, %v1207_v45  ;;  %v1209_v47 = vpop.f32.mrb[3].mxu0 }
 0x197   : > { %v1363_v48 = vadd.f32 %v1362_v44, %v1209_v47 }
 0x198   : > { %v1348_v49 = vmul.f32 -1.442695, %v1361_v46 }
 0x199   : > { %v1349_v50 = vmul.f32 -1.442695, %v1363_v48 }
 0x19a   : > { %1414 = vpow2.f32 %v1348_v49 }
 0x19b   : > { %1416 = vpow2.f32 %v1349_v50 }
 0x1a4   : > { %v1415_v51 = vpop.eup %1414 }
 0x1a5   : > { %v1417_v52 = vpop.eup %1416  ;;  %v1222_v53 = vadd.f32 1.0, %v1415_v51 }
 0x1a6   : > { %v1223_v54 = vadd.f32 1.0, %v1417_v52 }
 0x1a7   : > { %1418 = vrcp.f32 %v1222_v53 }
 0x1a8   : > { %1420 = vrcp.f32 %v1223_v54 }
 0x1b1   : > { %v1419_v55 = vpop.eup %1418 }
 0x1b2   : > { %v1421_v56 = vpop.eup %1420  ;;  %v1228_v57 = vmul.f32 %v1419_v55, %v1357_v39 }
 0x1b3   : > { %v1229_v58 = vmul.f32 %v1421_v56, %v1359_v41 }
 0x1b4   : > { %1230 = vst [vmem:[%s170_s19] sm:$0xff] %v1228_v57 }
 0x1b5   : > { %1231 = vst [vmem:[%s170_s19 + $0x8] sm:$0xff] %v1229_v58 }
 0x1b6 PF: > { %s13_s12 = sadd.s32 1, %s1428_s12  }
 0x1b7   : > { %p10_p4 = scmp.ge.s32.totalorder %s13_s12, 4  }
 0x1b9   :  { %12 = sbr.rel (!%p10_p4) target bundleno = 1 (0x1), region = 70 }

</bundles_post_ra>
